<compile_context>
chip_gen: v5e
topology: v5e:2x2
jax: 0.10.0
libtpu: 0.0.40
codegen_flags: <defaults>
</compile_context>

<pallas_src>
import functools

import jax
import jax.numpy as jnp
from jax.experimental import pallas as pl
from jax.experimental.pallas import tpu as pltpu

Z_DIM = 128       # `z_dimension` (undefined global in source) -> lane-aligned choice
HIDDEN = 256
OUT_DIM = 256     # `input_dimension` (undefined global in source) -> lane-aligned choice
TB_MAX = 2048     # batch tile upper bound (double-buffered tiles + weights << VMEM)


def _cdiv(a, b):
    return (a + b - 1) // b


def _round_up(n, m):
    return _cdiv(n, m) * m


def _gen_kernel(x_ref, w1_ref, b1_ref, w2_ref, b2_ref, w3_ref, b3_ref, o_ref):
    # Cast the streamed f32 input to bf16 on the VPU (inside the kernel, so the
    # HBM input stream stays a single f32 read with no extra wrapper pass).
    x = x_ref[...].astype(jnp.bfloat16)

    # Layer 1: Linear (bf16 MXU, f32 accumulate) + bias + ReLU, fused bf16 cast.
    h = jnp.dot(x, w1_ref[...], preferred_element_type=jnp.float32)
    h = jnp.maximum(h + b1_ref[...], 0.0).astype(jnp.bfloat16)

    # Layer 2: Linear + bias + ReLU, fused bf16 cast.
    h = jnp.dot(h, w2_ref[...], preferred_element_type=jnp.float32)
    h = jnp.maximum(h + b2_ref[...], 0.0).astype(jnp.bfloat16)

    # Layer 3: Linear + bias + Tanh (tanh goes to the EUP).
    z = jnp.dot(h, w3_ref[...], preferred_element_type=jnp.float32)
    o_ref[...] = jnp.tanh(z + b3_ref[...]).astype(o_ref.dtype)


@functools.partial(jax.jit, static_argnames=("tb_max", "out_dtype"))
def generator_forward(x, params, *, tb_max=TB_MAX, out_dtype=jnp.bfloat16):
    """x: (B, Z_DIM) float32. params: dict of w1,b1,w2,b2,w3,b3 (f32, (in,out) layout)."""
    B = x.shape[0]

    # Tile sizing:
    #  * at least 2 tiles when B >= 16 so v7x's two TensorCores stay busy,
    #  * tiles sized to ceil(B / n_tiles) rounded up to 8 sublanes, so padding
    #    is at most a few rows and the last tile is nearly full.
    n_tiles = max(_cdiv(B, tb_max), 2 if B >= 16 else 1)
    tb = _round_up(_cdiv(B, n_tiles), 8)
    b_pad = n_tiles * tb
    if b_pad != B:
        x = jnp.pad(x, ((0, b_pad - B), (0, 0)))

    # Weights are tiny and reused across all grid steps: cast to bf16 once.
    w1 = params["w1"].astype(jnp.bfloat16)
    w2 = params["w2"].astype(jnp.bfloat16)
    w3 = params["w3"].astype(jnp.bfloat16)
    b1, b2, b3 = params["b1"], params["b2"], params["b3"]

    resident = lambda shape: pl.BlockSpec(shape, lambda i: (0, 0))

    flops = 2 * b_pad * (Z_DIM * HIDDEN + HIDDEN * HIDDEN + HIDDEN * OUT_DIM)
    bytes_accessed = (
        b_pad * Z_DIM * 4                      # f32 input stream
        + b_pad * OUT_DIM * jnp.dtype(out_dtype).itemsize  # output stream
        + 2 * (Z_DIM * HIDDEN + HIDDEN * HIDDEN + HIDDEN * OUT_DIM)  # bf16 weights
        + 4 * (3 * HIDDEN)                     # f32 biases
    )

    out = pl.pallas_call(
        _gen_kernel,
        out_shape=jax.ShapeDtypeStruct((b_pad, OUT_DIM), out_dtype),
        grid=(n_tiles,),
        in_specs=[
            pl.BlockSpec((tb, Z_DIM), lambda i: (i, 0)),   # x: streamed per batch tile
            resident(w1.shape), resident(b1.shape),        # weights/biases: VMEM-resident
            resident(w2.shape), resident(b2.shape),
            resident(w3.shape), resident(b3.shape),
        ],
        out_specs=pl.BlockSpec((tb, OUT_DIM), lambda i: (i, 0)),
        compiler_params=pltpu.CompilerParams(
            dimension_semantics=("parallel",),
            vmem_limit_bytes=32 * 1024 * 1024,
        ),
        cost_estimate=pl.CostEstimate(
            flops=flops,
            transcendentals=b_pad * OUT_DIM,
            bytes_accessed=bytes_accessed,
        ),
    )(x, w1, b1, w2, b2, w3, b3)

    return out[:B]


def init_params(key):
    """PyTorch nn.Linear default init: U[-1/sqrt(fan_in), 1/sqrt(fan_in)], stored (in, out)."""
    ks = jax.random.split(key, 6)

    def linear(kw, kb, fan_in, fan_out):
        bound = 1.0 / jnp.sqrt(fan_in)
        w = jax.random.uniform(kw, (fan_in, fan_out), jnp.float32, -bound, bound)
        b = jax.random.uniform(kb, (1, fan_out), jnp.float32, -bound, bound)
        return w, b

    w1, b1 = linear(ks[0], ks[1], Z_DIM, HIDDEN)
    w2, b2 = linear(ks[2], ks[3], HIDDEN, HIDDEN)
    w3, b3 = linear(ks[4], ks[5], HIDDEN, OUT_DIM)
    return {"w1": w1, "b1": b1, "w2": w2, "b2": b2, "w3": w3, "b3": b3}


def _reference(x, p):
    """Pure-JAX reference with matching bf16-matmul / f32-accumulate / bf16-intermediate numerics."""
    h = jnp.dot(x.astype(jnp.bfloat16), p["w1"].astype(jnp.bfloat16),
                preferred_element_type=jnp.float32)
    h = jnp.maximum(h + p["b1"], 0.0).astype(jnp.bfloat16)
    h = jnp.dot(h, p["w2"].astype(jnp.bfloat16),
                preferred_element_type=jnp.float32)
    h = jnp.maximum(h + p["b2"], 0.0).astype(jnp.bfloat16)
    z = jnp.dot(h, p["w3"].astype(jnp.bfloat16),
                preferred_element_type=jnp.float32)
    return jnp.tanh(z + p["b3"])


if __name__ == "__main__":
    key = jax.random.PRNGKey(0)
    kx, kp = jax.random.split(key)
    B = 8
    x = jax.random.normal(kx, (B, Z_DIM), jnp.float32)
    params = init_params(kp)

    out = generator_forward(x, params)
    jax.block_until_ready(out)

    ref = _reference(x, params)
    assert out.shape == (B, OUT_DIM), out.shape
    # Output is bf16 (tanh range [-1,1]); tolerance covers the final bf16 rounding.
    err = float(jnp.max(jnp.abs(out.astype(jnp.float32) - ref)))
    assert jnp.allclose(out.astype(jnp.float32), ref, atol=8e-3, rtol=1e-2), err
    print("KERNEL_OK")
</pallas_src>

<mosaic_0001>
module attributes {stable_mosaic.version = 11 : i64} {
  func.func @_gen_kernel(%arg0: i32, %arg1: memref<8x128xf32, #tpu.memory_space<vmem>>, %arg2: memref<128x256xbf16, #tpu.memory_space<vmem>>, %arg3: memref<1x256xf32, #tpu.memory_space<vmem>>, %arg4: memref<256x256xbf16, #tpu.memory_space<vmem>>, %arg5: memref<1x256xf32, #tpu.memory_space<vmem>>, %arg6: memref<256x256xbf16, #tpu.memory_space<vmem>>, %arg7: memref<1x256xf32, #tpu.memory_space<vmem>>, %arg8: memref<8x256xbf16, #tpu.memory_space<vmem>>) attributes {dimension_semantics = [#tpu.dimension_semantics<parallel>], iteration_bounds = array<i64: 1>, scalar_prefetch = 0 : i64, scratch_operands = 0 : i64, tpu.core_type = #tpu.core_type<tc>, window_params = [{transform_indices = @transform_0, window_bounds = array<i64: 8, 128>}, {pipeline_mode = #tpu.pipeline_mode<synchronous>, transform_indices = @transform_1, window_bounds = array<i64: 128, 256>}, {pipeline_mode = #tpu.pipeline_mode<synchronous>, transform_indices = @transform_2, window_bounds = array<i64: 1, 256>}, {pipeline_mode = #tpu.pipeline_mode<synchronous>, transform_indices = @transform_3, window_bounds = array<i64: 256, 256>}, {pipeline_mode = #tpu.pipeline_mode<synchronous>, transform_indices = @transform_4, window_bounds = array<i64: 1, 256>}, {pipeline_mode = #tpu.pipeline_mode<synchronous>, transform_indices = @transform_5, window_bounds = array<i64: 256, 256>}, {pipeline_mode = #tpu.pipeline_mode<synchronous>, transform_indices = @transform_6, window_bounds = array<i64: 1, 256>}, {transform_indices = @transform_7, window_bounds = array<i64: 8, 256>}]} {
    %c0 = arith.constant 0 : index
    %c0_0 = arith.constant 0 : index
    %0 = vector.load %arg1[%c0, %c0_0] : memref<8x128xf32, #tpu.memory_space<vmem>>, vector<8x128xf32>
    %1 = arith.truncf %0 : vector<8x128xf32> to vector<8x128xbf16>
    %c0_1 = arith.constant 0 : index
    %c0_2 = arith.constant 0 : index
    %2 = vector.load %arg2[%c0_1, %c0_2] : memref<128x256xbf16, #tpu.memory_space<vmem>>, vector<128x256xbf16>
    %cst = arith.constant dense<0.000000e+00> : vector<8x256xf32>
    %3 = tpu.matmul %1, %2, %cst {dimension_numbers = #tpu.dot_dimension_numbers<[1], [0], [0], [1], [0, 0, 1, 1], [], []>} : vector<8x128xbf16>, vector<128x256xbf16>, vector<8x256xf32> -> vector<8x256xf32>
    %c0_3 = arith.constant 0 : index
    %c0_4 = arith.constant 0 : index
    %4 = vector.load %arg3[%c0_3, %c0_4] : memref<1x256xf32, #tpu.memory_space<vmem>>, vector<1x256xf32>
    %5 = vector.broadcast %4 : vector<1x256xf32> to vector<8x256xf32>
    %6 = arith.addf %3, %5 : vector<8x256xf32>
    %cst_5 = arith.constant 0.000000e+00 : f32
    %7 = vector.broadcast %cst_5 : f32 to vector<8x256xf32>
    %8 = arith.maximumf %6, %7 : vector<8x256xf32>
    %9 = arith.truncf %8 : vector<8x256xf32> to vector<8x256xbf16>
    %c0_6 = arith.constant 0 : index
    %c0_7 = arith.constant 0 : index
    %10 = vector.load %arg4[%c0_6, %c0_7] : memref<256x256xbf16, #tpu.memory_space<vmem>>, vector<256x256xbf16>
    %cst_8 = arith.constant dense<0.000000e+00> : vector<8x256xf32>
    %11 = tpu.matmul %9, %10, %cst_8 {dimension_numbers = #tpu.dot_dimension_numbers<[1], [0], [0], [1], [0, 0, 1, 1], [], []>} : vector<8x256xbf16>, vector<256x256xbf16>, vector<8x256xf32> -> vector<8x256xf32>
    %c0_9 = arith.constant 0 : index
    %c0_10 = arith.constant 0 : index
    %12 = vector.load %arg5[%c0_9, %c0_10] : memref<1x256xf32, #tpu.memory_space<vmem>>, vector<1x256xf32>
    %13 = vector.broadcast %12 : vector<1x256xf32> to vector<8x256xf32>
    %14 = arith.addf %11, %13 : vector<8x256xf32>
    %cst_11 = arith.constant 0.000000e+00 : f32
    %15 = vector.broadcast %cst_11 : f32 to vector<8x256xf32>
    %16 = arith.maximumf %14, %15 : vector<8x256xf32>
    %17 = arith.truncf %16 : vector<8x256xf32> to vector<8x256xbf16>
    %c0_12 = arith.constant 0 : index
    %c0_13 = arith.constant 0 : index
    %18 = vector.load %arg6[%c0_12, %c0_13] : memref<256x256xbf16, #tpu.memory_space<vmem>>, vector<256x256xbf16>
    %cst_14 = arith.constant dense<0.000000e+00> : vector<8x256xf32>
    %19 = tpu.matmul %17, %18, %cst_14 {dimension_numbers = #tpu.dot_dimension_numbers<[1], [0], [0], [1], [0, 0, 1, 1], [], []>} : vector<8x256xbf16>, vector<256x256xbf16>, vector<8x256xf32> -> vector<8x256xf32>
    %c0_15 = arith.constant 0 : index
    %c0_16 = arith.constant 0 : index
    %20 = vector.load %arg7[%c0_15, %c0_16] : memref<1x256xf32, #tpu.memory_space<vmem>>, vector<1x256xf32>
    %21 = vector.broadcast %20 : vector<1x256xf32> to vector<8x256xf32>
    %22 = arith.addf %19, %21 : vector<8x256xf32>
    %23 = math.tanh %22 : vector<8x256xf32>
    %24 = arith.truncf %23 : vector<8x256xf32> to vector<8x256xbf16>
    %c0_17 = arith.constant 0 : index
    %c0_18 = arith.constant 0 : index
    %25 = vector.load %arg8[%c0_17, %c0_18] : memref<8x256xbf16, #tpu.memory_space<vmem>>, vector<8x256xbf16>
    tpu.vector_store %arg8[%c0_17, %c0_18], %24 {strides = array<i32>} : memref<8x256xbf16, #tpu.memory_space<vmem>>, vector<8x256xbf16>,
    return
  }
  func.func @transform_0(%arg0: i32) -> (i32, i32) {
    %c0_i32 = arith.constant 0 : i32
    %c0_i32_0 = arith.constant 0 : i32
    return %arg0, %c0_i32 : i32, i32
  }
  func.func @transform_1(%arg0: i32) -> (i32, i32) {
    %c0_i32 = arith.constant 0 : i32
    %c0_i32_0 = arith.constant 0 : i32
    %c0_i32_1 = arith.constant 0 : i32
    return %c0_i32, %c0_i32_0 : i32, i32
  }
  func.func @transform_2(%arg0: i32) -> (i32, i32) {
    %c0_i32 = arith.constant 0 : i32
    %c0_i32_0 = arith.constant 0 : i32
    %c0_i32_1 = arith.constant 0 : i32
    return %c0_i32, %c0_i32_0 : i32, i32
  }
  func.func @transform_3(%arg0: i32) -> (i32, i32) {
    %c0_i32 = arith.constant 0 : i32
    %c0_i32_0 = arith.constant 0 : i32
    %c0_i32_1 = arith.constant 0 : i32
    return %c0_i32, %c0_i32_0 : i32, i32
  }
  func.func @transform_4(%arg0: i32) -> (i32, i32) {
    %c0_i32 = arith.constant 0 : i32
    %c0_i32_0 = arith.constant 0 : i32
    %c0_i32_1 = arith.constant 0 : i32
    return %c0_i32, %c0_i32_0 : i32, i32
  }
  func.func @transform_5(%arg0: i32) -> (i32, i32) {
    %c0_i32 = arith.constant 0 : i32
    %c0_i32_0 = arith.constant 0 : i32
    %c0_i32_1 = arith.constant 0 : i32
    return %c0_i32, %c0_i32_0 : i32, i32
  }
  func.func @transform_6(%arg0: i32) -> (i32, i32) {
    %c0_i32 = arith.constant 0 : i32
    %c0_i32_0 = arith.constant 0 : i32
    %c0_i32_1 = arith.constant 0 : i32
    return %c0_i32, %c0_i32_0 : i32, i32
  }
  func.func @transform_7(%arg0: i32) -> (i32, i32) {
    %c0_i32 = arith.constant 0 : i32
    %c0_i32_0 = arith.constant 0 : i32
    return %arg0, %c0_i32 : i32, i32
  }
}

</mosaic_0001>

<bundles_post_ra>
// kernel: generator_forward.1
= control target key start
LH: loop header
LB: loop body
LE: loop exit
PB: predicated region body
PF: predicated region fallthrough
CT: control target
= control target key end

     0   :  { %s1652_s0 = inlined_call_operand.vmem [shape: f32[8,128], index: 0, kind: input, shape index: {}]   ;;  %s1653_s1 = inlined_call_operand.vmem [shape: bf16[128,256], index: 1, kind: input, shape index: {}]   ;;  %s1654_s2 = inlined_call_operand.vmem [shape: f32[1,256], index: 2, kind: input, shape index: {}]   ;;  %s1655_s3 = inlined_call_operand.vmem [shape: bf16[256,256], index: 3, kind: input, shape index: {}]   ;;  %s1656_s4 = inlined_call_operand.vmem [shape: f32[1,256], index: 4, kind: input, shape index: {}]   ;;  %s1657_s5 = inlined_call_operand.vmem [shape: bf16[256,256], index: 5, kind: input, shape index: {}]   ;;  %s1658_s6 = inlined_call_operand.vmem [shape: f32[1,256], index: 6, kind: input, shape index: {}]   ;;  %s1659_s7 = inlined_call_operand.hbm [shape: bf16[8,256], index: 7, kind: output, shape index: {}]  }
   0x1   :  { %v743_v0 = vld [vmem:[%s1653_s1 + $0x70] sm:$0xf]  ;;  %v1020_v1 = vld [vmem:[%s1653_s1 + $0x74] sm:$0xf0]  ;;  %v1019_v2 = vld [vmem:[%s1653_s1 + $0x74] sm:$0xf] }
   0x2   :  { %v744_v3 = vor.u32 %v1020_v1, %v743_v0  ;;  %v745_v4 = vld [vmem:[%s1653_s1 + $0x78] sm:$0xf0]  ;;  %v735_v5 = vld [vmem:[%s1653_s1 + $0x60] sm:$0xf]  ;;  %v1018_v6 = vld [vmem:[%s1653_s1 + $0x64] sm:$0xf0] }
   0x3   :  { %v748_v7 = vor.u32 %v1019_v2, %v745_v4  ;;  %v1017_v8 = vld [vmem:[%s1653_s1 + $0x64] sm:$0xf]  ;;  %v737_v9 = vld [vmem:[%s1653_s1 + $0x68] sm:$0xf0]  ;;  %v736_v10 = vor.u32 %v1018_v6, %v735_v5  ;;  %v727_v12 = vld [vmem:[%s1653_s1 + $0x50] sm:$0xf] }
   0x4   :  { %131 = vmatpush.bf16.msra.mxu0 %v744_v3  ;;  %v740_v11 = vor.u32 %v1017_v8, %v737_v9  ;;  %v1016_v13 = vld [vmem:[%s1653_s1 + $0x54] sm:$0xf0]  ;;  %v1015_v14 = vld [vmem:[%s1653_s1 + $0x54] sm:$0xf]  ;;  %v729_v15 = vld [vmem:[%s1653_s1 + $0x58] sm:$0xf0] }
   0x5   :  { %144 = vmatpush.bf16.msra.mxu1 %v748_v7  ;;  %v728_v16 = vor.u32 %v1016_v13, %v727_v12  ;;  %v732_v17 = vor.u32 %v1015_v14, %v729_v15  ;;  %v719_v18 = vld [vmem:[%s1653_s1 + $0x40] sm:$0xf]  ;;  %v1014_v19 = vld [vmem:[%s1653_s1 + $0x44] sm:$0xf0]  ;;  %v1013_v20 = vld [vmem:[%s1653_s1 + $0x44] sm:$0xf] }
   0x6   :  { %v721_v21 = vld [vmem:[%s1653_s1 + $0x48] sm:$0xf0]  ;;  %v720_v22 = vor.u32 %v1014_v19, %v719_v18  ;;  %v807_v23 = vld [vmem:[%s1655_s3 + $0x70] sm:$0xf]  ;;  %v1036_v24 = vld [vmem:[%s1655_s3 + $0x74] sm:$0xf0] }
   0x7   :  { %v871_v25 = vld [vmem:[%s1655_s3 + $0xf0] sm:$0xf]  ;;  %v724_v26 = vor.u32 %v1013_v20, %v721_v21  ;;  %v1012_v28 = vld [vmem:[%s1653_s1 + $0x34] sm:$0xf0]  ;;  %v808_v29 = vor.u32 %v1036_v24, %v807_v23  ;;  %v1011_v31 = vld [vmem:[%s1653_s1 + $0x34] sm:$0xf] }
   0x8   :  { %132 = vmatpush.bf16.msra.mxu0 %v736_v10  ;;  %v711_v27 = vld [vmem:[%s1653_s1 + $0x30] sm:$0xf]  ;;  %v1052_v30 = vld [vmem:[%s1655_s3 + $0xf4] sm:$0xf0]  ;;  %v713_v32 = vld [vmem:[%s1653_s1 + $0x38] sm:$0xf0] }
   0x9   :  { %145 = vmatpush.bf16.msra.mxu1 %v740_v11  ;;  %v872_v33 = vor.u32 %v1052_v30, %v871_v25  ;;  %v799_v34 = vld [vmem:[%s1655_s3 + $0x60] sm:$0xf]  ;;  %359 = vmatpush.bf16.msra.mxu2 %v808_v29  ;;  %v1034_v35 = vld [vmem:[%s1655_s3 + $0x64] sm:$0xf0]  ;;  %v712_v38 = vor.u32 %v1012_v28, %v711_v27  ;;  %v716_v43 = vor.u32 %v1011_v31, %v713_v32  ;;  %v1009_v44 = vld [vmem:[%s1653_s1 + $0x24] sm:$0xf] }
   0xa   :  { %v863_v36 = vld [vmem:[%s1655_s3 + $0xe0] sm:$0xf]  ;;  %v1050_v37 = vld [vmem:[%s1655_s3 + $0xe4] sm:$0xf0]  ;;  %v800_v41 = vor.u32 %v1034_v35, %v799_v34  ;;  %v791_v45 = vld [vmem:[%s1655_s3 + $0x50] sm:$0xf] }
   0xb   :  { %v703_v39 = vld [vmem:[%s1653_s1 + $0x20] sm:$0xf]  ;;  %v1010_v40 = vld [vmem:[%s1653_s1 + $0x24] sm:$0xf0]  ;;  %372 = vmatpush.bf16.msra.mxu3 %v872_v33  ;;  %v864_v42 = vor.u32 %v1050_v37, %v863_v36  ;;  %v1032_v46 = vld [vmem:[%s1655_s3 + $0x54] sm:$0xf0] }
   0xc   :  { %133 = vmatpush.bf16.msra.mxu0 %v728_v16  ;;  %v705_v47 = vld [vmem:[%s1653_s1 + $0x28] sm:$0xf0]  ;;  %v855_v48 = vld [vmem:[%s1655_s3 + $0xd0] sm:$0xf]  ;;  %v1048_v49 = vld [vmem:[%s1655_s3 + $0xd4] sm:$0xf0]  ;;  %v792_v50 = vor.u32 %v1032_v46, %v791_v45  ;;  %v704_v51 = vor.u32 %v1010_v40, %v703_v39 }
   0xd   :  { %146 = vmatpush.bf16.msra.mxu1 %v732_v17  ;;  %360 = vmatpush.bf16.msra.mxu2 %v800_v41  ;;  %v695_v52 = vld [vmem:[%s1653_s1 + $0x10] sm:$0xf]  ;;  %v856_v53 = vor.u32 %v1048_v49, %v855_v48  ;;  %v783_v54 = vld [vmem:[%s1655_s3 + $0x40] sm:$0xf]  ;;  %v1030_v55 = vld [vmem:[%s1655_s3 + $0x44] sm:$0xf0]  ;;  %v708_v56 = vor.u32 %v1009_v44, %v705_v47 }
   0xe   :  { %v1008_v57 = vld [vmem:[%s1653_s1 + $0x14] sm:$0xf0]  ;;  %v847_v58 = vld [vmem:[%s1655_s3 + $0xc0] sm:$0xf]  ;;  %v1046_v59 = vld [vmem:[%s1655_s3 + $0xc4] sm:$0xf0]  ;;  %v784_v63 = vor.u32 %v1030_v55, %v783_v54 }
   0xf   :  { %373 = vmatpush.bf16.msra.mxu3 %v864_v42  ;;  %v1007_v60 = vld [vmem:[%s1653_s1 + $0x14] sm:$0xf]  ;;  %v697_v61 = vld [vmem:[%s1653_s1 + $0x18] sm:$0xf0]  ;;  %v687_v62 = vld [vmem:[%s1653_s1] sm:$0xf]  ;;  %v696_v0 = vor.u32 %v1008_v57, %v695_v52  ;;  %v848_v2 = vor.u32 %v1046_v59, %v847_v58 }
  0x10   :  { %134 = vmatpush.bf16.msra.mxu0 %v720_v22  ;;  %v1006_v1 = vld [vmem:[%s1653_s1 + $0x4] sm:$0xf0]  ;;  %v775_v3 = vld [vmem:[%s1655_s3 + $0x30] sm:$0xf]  ;;  %v1028_v4 = vld [vmem:[%s1655_s3 + $0x34] sm:$0xf0]  ;;  %v700_v5 = vor.u32 %v1007_v60, %v697_v61 }
  0x11   :  { %147 = vmatpush.bf16.msra.mxu1 %v724_v26  ;;  %361 = vmatpush.bf16.msra.mxu2 %v792_v50  ;;  %v1005_v6 = vld [vmem:[%s1653_s1 + $0x4] sm:$0xf]  ;;  %v839_v7 = vld [vmem:[%s1655_s3 + $0xb0] sm:$0xf]  ;;  %v1044_v8 = vld [vmem:[%s1655_s3 + $0xb4] sm:$0xf0]  ;;  %v776_v15 = vor.u32 %v1028_v4, %v775_v3  ;;  %v688_v16 = vor.u32 %v1006_v1, %v687_v62 }
  0x12   :  { %v689_v9 = vld [vmem:[%s1653_s1 + $0x8] sm:$0xf0]  ;;  %v1035_v10 = vld [vmem:[%s1655_s3 + $0x74] sm:$0xf]  ;;  %v809_v11 = vld [vmem:[%s1655_s3 + $0x78] sm:$0xf0]  ;;  %v840_v17 = vor.u32 %v1044_v8, %v839_v7 }
  0x13   :  { %374 = vmatpush.bf16.msra.mxu3 %v856_v53  ;;  %v27_v12 = vld [vmem:[%s1652_s0] sm:$0xff]  ;;  %v1051_v13 = vld [vmem:[%s1655_s3 + $0xf4] sm:$0xf]  ;;  %v873_v14 = vld [vmem:[%s1655_s3 + $0xf8] sm:$0xf0] }
  0x14   :  { %135 = vmatpush.bf16.msra.mxu0 %v712_v38  ;;  %v767_v18 = vld [vmem:[%s1655_s3 + $0x20] sm:$0xf]  ;;  %v1026_v19 = vld [vmem:[%s1655_s3 + $0x24] sm:$0xf0] }
  0x15   :  { %148 = vmatpush.bf16.msra.mxu1 %v716_v43  ;;  %362 = vmatpush.bf16.msra.mxu2 %v784_v63 }
  0x17   :  { %375 = vmatpush.bf16.msra.mxu3 %v848_v2 }
  0x18   :  { %136 = vmatpush.bf16.msra.mxu0 %v704_v51 }
  0x19   :  { %149 = vmatpush.bf16.msra.mxu1 %v708_v56 }
  0x1c   :  { %137 = vmatpush.bf16.msra.mxu0 %v696_v0 }
  0x1d   :  { %12 = vsyncpa [#allocation3], 0  ;;  %150 = vmatpush.bf16.msra.mxu1 %v700_v5  ;;  %v692_v20 = vor.u32 %v1005_v6, %v689_v9  ;;  %v812_v21 = vor.u32 %v1035_v10, %v809_v11  ;;  %v831_v22 = vld [vmem:[%s1655_s3 + $0xa0] sm:$0xf]  ;;  %v1042_v23 = vld [vmem:[%s1655_s3 + $0xa4] sm:$0xf0]  ;;  %v876_v24 = vor.u32 %v1051_v13, %v873_v14  ;;  %v28_v27 = vpack.c.bf16 %v27_v12, %v27_v12 }
  0x1e   :  { %v1033_v25 = vld [vmem:[%s1655_s3 + $0x64] sm:$0xf]  ;;  %v801_v26 = vld [vmem:[%s1655_s3 + $0x68] sm:$0xf0]  ;;  %363 = vmatpush.bf16.msra.mxu2 %v776_v15  ;;  %v768_v30 = vor.u32 %v1026_v19, %v767_v18  ;;  %376 = vmatpush.bf16.msra.mxu3 %v840_v17  ;;  %v832_v31 = vor.u32 %v1042_v23, %v831_v22  ;;  %v1031_v34 = vld [vmem:[%s1655_s3 + $0x54] sm:$0xf] }
  0x1f   :  { %v1049_v28 = vld [vmem:[%s1655_s3 + $0xe4] sm:$0xf]  ;;  %v865_v29 = vld [vmem:[%s1655_s3 + $0xe8] sm:$0xf0]  ;;  %v804_v32 = vor.u32 %v1033_v25, %v801_v26  ;;  %v793_v35 = vld [vmem:[%s1655_s3 + $0x58] sm:$0xf0] }
  0x20   :  { %138 = vmatpush.bf16.msra.mxu0 %v688_v16  ;;  %v868_v33 = vor.u32 %v1049_v28, %v865_v29  ;;  %v1047_v36 = vld [vmem:[%s1655_s3 + $0xd4] sm:$0xf]  ;;  %v857_v37 = vld [vmem:[%s1655_s3 + $0xd8] sm:$0xf0]  ;;  %v796_v38 = vor.u32 %v1031_v34, %v793_v35  ;;  %v1029_v40 = vld [vmem:[%s1655_s3 + $0x44] sm:$0xf] }
  0x21   :  { %151 = vmatpush.bf16.msra.mxu1 %v692_v20  ;;  %v860_v39 = vor.u32 %v1047_v36, %v857_v37  ;;  %v785_v41 = vld [vmem:[%s1655_s3 + $0x48] sm:$0xf0]  ;;  %v1045_v42 = vld [vmem:[%s1655_s3 + $0xc4] sm:$0xf]  ;;  %v1027_v46 = vld [vmem:[%s1655_s3 + $0x34] sm:$0xf] }
  0x22   :  { %364 = vmatpush.bf16.msra.mxu2 %v768_v30  ;;  %377 = vmatpush.bf16.msra.mxu3 %v832_v31  ;;  %v849_v43 = vld [vmem:[%s1655_s3 + $0xc8] sm:$0xf0]  ;;  %v788_v44 = vor.u32 %v1029_v40, %v785_v41  ;;  %v777_v47 = vld [vmem:[%s1655_s3 + $0x38] sm:$0xf0]  ;;  %v1043_v48 = vld [vmem:[%s1655_s3 + $0xb4] sm:$0xf] }
  0x23   :  { %139 = vmatmul.bf16.vlgmr.msra.gmra.mxu0 %v28_v27  ;;  %v852_v45 = vor.u32 %v1045_v42, %v849_v43  ;;  %v841_v49 = vld [vmem:[%s1655_s3 + $0xb8] sm:$0xf0]  ;;  %v780_v50 = vor.u32 %v1027_v46, %v777_v47  ;;  %v1025_v52 = vld [vmem:[%s1655_s3 + $0x24] sm:$0xf]  ;;  %v769_v53 = vld [vmem:[%s1655_s3 + $0x28] sm:$0xf0] }
  0x24   :  { %385 = vmatpush.bf16.msrb.mxu0 %v812_v21  ;;  %152 = vmatmul.bf16.vlgmr.msra.gmra.mxu1 %v28_v27  ;;  %v844_v51 = vor.u32 %v1043_v48, %v841_v49  ;;  %v1041_v54 = vld [vmem:[%s1655_s3 + $0xa4] sm:$0xf]  ;;  %v833_v55 = vld [vmem:[%s1655_s3 + $0xa8] sm:$0xf0]  ;;  %v772_v56 = vor.u32 %v1025_v52, %v769_v53  ;;  %v759_v58 = vld [vmem:[%s1655_s3 + $0x10] sm:$0xf] }
  0x25   :  { %398 = vmatpush.bf16.msrb.mxu1 %v876_v24  ;;  %v836_v57 = vor.u32 %v1041_v54, %v833_v55  ;;  %v1024_v59 = vld [vmem:[%s1655_s3 + $0x14] sm:$0xf0]  ;;  %v823_v60 = vld [vmem:[%s1655_s3 + $0x90] sm:$0xf]  ;;  %v1023_v63 = vld [vmem:[%s1655_s3 + $0x14] sm:$0xf] }
  0x26   :  { %v760_v61 = vor.u32 %v1024_v59, %v759_v58  ;;  %v1040_v62 = vld [vmem:[%s1655_s3 + $0x94] sm:$0xf0]  ;;  %v761_v0 = vld [vmem:[%s1655_s3 + $0x18] sm:$0xf0]  ;;  %v1039_v3 = vld [vmem:[%s1655_s3 + $0x94] sm:$0xf] }
  0x27   :  { %v824_v1 = vor.u32 %v1040_v62, %v823_v60  ;;  %v764_v2 = vor.u32 %v1023_v63, %v761_v0  ;;  %v825_v4 = vld [vmem:[%s1655_s3 + $0x98] sm:$0xf0]  ;;  %v751_v6 = vld [vmem:[%s1655_s3] sm:$0xf]  ;;  %v1022_v7 = vld [vmem:[%s1655_s3 + $0x4] sm:$0xf0] }
  0x28   :  { %386 = vmatpush.bf16.msrb.mxu0 %v804_v32  ;;  %365 = vmatpush.bf16.msra.mxu2 %v760_v61  ;;  %v828_v5 = vor.u32 %v1039_v3, %v825_v4  ;;  %v815_v8 = vld [vmem:[%s1655_s3 + $0x80] sm:$0xf]  ;;  %v752_v9 = vor.u32 %v1022_v7, %v751_v6  ;;  %v1038_v10 = vld [vmem:[%s1655_s3 + $0x84] sm:$0xf0]  ;;  %v1021_v11 = vld [vmem:[%s1655_s3 + $0x4] sm:$0xf] }
  0x29   :  { %399 = vmatpush.bf16.msrb.mxu1 %v868_v33  ;;  %378 = vmatpush.bf16.msra.mxu3 %v824_v1  ;;  %v753_v12 = vld [vmem:[%s1655_s3 + $0x8] sm:$0xf0]  ;;  %v816_v13 = vor.u32 %v1038_v10, %v815_v8  ;;  %v1037_v15 = vld [vmem:[%s1655_s3 + $0x84] sm:$0xf]  ;;  %v999_v18 = vld [vmem:[%s1657_s5 + $0xf0] sm:$0xf] }
  0x2a   :  { %v756_v14 = vor.u32 %v1021_v11, %v753_v12  ;;  %v817_v16 = vld [vmem:[%s1655_s3 + $0x88] sm:$0xf0]  ;;  %v1084_v19 = vld [vmem:[%s1657_s5 + $0xf4] sm:$0xf0]  ;;  %v1083_v20 = vld [vmem:[%s1657_s5 + $0xf4] sm:$0xf] }
  0x2b   :  { %v820_v17 = vor.u32 %v1037_v15, %v817_v16  ;;  %v1000_v21 = vor.u32 %v1084_v19, %v999_v18  ;;  %v1001_v22 = vld [vmem:[%s1657_s5 + $0xf8] sm:$0xf0]  ;;  %v991_v23 = vld [vmem:[%s1657_s5 + $0xe0] sm:$0xf]  ;;  %v1082_v24 = vld [vmem:[%s1657_s5 + $0xe4] sm:$0xf0] }
  0x2c   :  { %387 = vmatpush.bf16.msrb.mxu0 %v796_v38  ;;  %366 = vmatpush.bf16.msra.mxu2 %v752_v9  ;;  %v1004_v25 = vor.u32 %v1083_v20, %v1001_v22  ;;  %v1081_v26 = vld [vmem:[%s1657_s5 + $0xe4] sm:$0xf]  ;;  %v993_v27 = vld [vmem:[%s1657_s5 + $0xe8] sm:$0xf0]  ;;  %v935_v28 = vld [vmem:[%s1657_s5 + $0x70] sm:$0xf]  ;;  %v992_v29 = vor.u32 %v1082_v24, %v991_v23 }
  0x2d   :  { %400 = vmatpush.bf16.msrb.mxu1 %v860_v39  ;;  %379 = vmatpush.bf16.msra.mxu3 %v816_v13  ;;  %v1068_v30 = vld [vmem:[%s1657_s5 + $0x74] sm:$0xf0]  ;;  %v1067_v31 = vld [vmem:[%s1657_s5 + $0x74] sm:$0xf]  ;;  %v937_v32 = vld [vmem:[%s1657_s5 + $0x78] sm:$0xf0]  ;;  %v996_v33 = vor.u32 %v1081_v26, %v993_v27 }
  0x2e   :  { %v936_v34 = vor.u32 %v1068_v30, %v935_v28  ;;  %v940_v35 = vor.u32 %v1067_v31, %v937_v32  ;;  %v983_v36 = vld [vmem:[%s1657_s5 + $0xd0] sm:$0xf]  ;;  %v1080_v37 = vld [vmem:[%s1657_s5 + $0xd4] sm:$0xf0]  ;;  %v1079_v38 = vld [vmem:[%s1657_s5 + $0xd4] sm:$0xf] }
  0x2f   :  { %v985_v39 = vld [vmem:[%s1657_s5 + $0xd8] sm:$0xf0]  ;;  %v927_v40 = vld [vmem:[%s1657_s5 + $0x60] sm:$0xf]  ;;  %v1066_v41 = vld [vmem:[%s1657_s5 + $0x64] sm:$0xf0] }
  0x30   :  { %388 = vmatpush.bf16.msrb.mxu0 %v788_v44  ;;  %613 = vmatpush.bf16.msrb.mxu2 %v936_v34  ;;  %v928_v42 = vor.u32 %v1066_v41, %v927_v40  ;;  %v1065_v43 = vld [vmem:[%s1657_s5 + $0x64] sm:$0xf]  ;;  %v929_v44 = vld [vmem:[%s1657_s5 + $0x68] sm:$0xf0]  ;;  %v975_v47 = vld [vmem:[%s1657_s5 + $0xc0] sm:$0xf]  ;;  %v988_v49 = vor.u32 %v1079_v38, %v985_v39 }
  0x31   :  { %401 = vmatpush.bf16.msrb.mxu1 %v852_v45  ;;  %626 = vmatpush.bf16.msrb.mxu3 %v1000_v21  ;;  %v984_v45 = vor.u32 %v1080_v37, %v983_v36  ;;  %v932_v46 = vor.u32 %v1065_v43, %v929_v44  ;;  %v1078_v48 = vld [vmem:[%s1657_s5 + $0xc4] sm:$0xf0]  ;;  %v1063_v52 = vld [vmem:[%s1657_s5 + $0x54] sm:$0xf]  ;;  %v1077_v53 = vld [vmem:[%s1657_s5 + $0xc4] sm:$0xf] }
  0x32   :  { %v977_v54 = vld [vmem:[%s1657_s5 + $0xc8] sm:$0xf0]  ;;  %v921_v55 = vld [vmem:[%s1657_s5 + $0x58] sm:$0xf0]  ;;  %v911_v58 = vld [vmem:[%s1657_s5 + $0x40] sm:$0xf]  ;;  %v976_v59 = vor.u32 %v1078_v48, %v975_v47 }
  0x33   :  { %v1062_v60 = vld [vmem:[%s1657_s5 + $0x44] sm:$0xf0]  ;;  %v1061_v61 = vld [vmem:[%s1657_s5 + $0x44] sm:$0xf]  ;;  %v913_v62 = vld [vmem:[%s1657_s5 + $0x48] sm:$0xf0]  ;;  %v980_v63 = vor.u32 %v1077_v53, %v977_v54 }
  0x34   :  { %389 = vmatpush.bf16.msrb.mxu0 %v780_v50  ;;  %v919_v50 = vld [vmem:[%s1657_s5 + $0x50] sm:$0xf]  ;;  %614 = vmatpush.bf16.msrb.mxu2 %v928_v42  ;;  %v1076_v1 = vld [vmem:[%s1657_s5 + $0xb4] sm:$0xf0]  ;;  %v969_v3 = vld [vmem:[%s1657_s5 + $0xb8] sm:$0xf0]  ;;  %v912_v4 = vor.u32 %v1062_v60, %v911_v58 }
  0x35   :  { %402 = vmatpush.bf16.msrb.mxu1 %v844_v51  ;;  %627 = vmatpush.bf16.msrb.mxu3 %v992_v29  ;;  %v1064_v51 = vld [vmem:[%s1657_s5 + $0x54] sm:$0xf0]  ;;  %v967_v0 = vld [vmem:[%s1657_s5 + $0xb0] sm:$0xf]  ;;  %v959_v8 = vld [vmem:[%s1657_s5 + $0xa0] sm:$0xf] }
  0x36   :  { %v968_v6 = vor.u32 %v1076_v1, %v967_v0  ;;  %v1074_v9 = vld [vmem:[%s1657_s5 + $0xa4] sm:$0xf0]  ;;  %v45_v10 = vld [vmem:[%s1654_s2] sm:$0x3]  ;;  %v1073_v11 = vld [vmem:[%s1657_s5 + $0xa4] sm:$0xf] }
  0x37   :  { %v961_v12 = vld [vmem:[%s1657_s5 + $0xa8] sm:$0xf0]  ;;  %v960_v13 = vor.u32 %v1074_v9, %v959_v8  ;;  %v48_v16 = vperm.slane %v45_v10, 1  ;;  %v903_v27 = vld [vmem:[%s1657_s5 + $0x30] sm:$0xf]  ;;  %s1116_s26 = smov [#allocation2]  }
  0x38   :  { %390 = vmatpush.bf16.msrb.mxu0 %v772_v56  ;;  %v920_v56 = vor.u32 %v1064_v51, %v919_v50  ;;  %v964_v15 = vor.u32 %v1073_v11, %v961_v12  ;;  %v1060_v28 = vld [vmem:[%s1657_s5 + $0x34] sm:$0xf0]  ;;  %v1059_v29 = vld [vmem:[%s1657_s5 + $0x34] sm:$0xf]  ;;  %v905_v31 = vld [vmem:[%s1657_s5 + $0x38] sm:$0xf0] }
  0x39   :  { %403 = vmatpush.bf16.msrb.mxu1 %v836_v57  ;;  %v924_v57 = vor.u32 %v1063_v52, %v921_v55  ;;  %628 = vmatpush.bf16.msrb.mxu3 %v984_v45  ;;  %v904_v30 = vor.u32 %v1060_v28, %v903_v27  ;;  %v908_v32 = vor.u32 %v1059_v29, %v905_v31  ;;  %v1072_v34 = vld [vmem:[%s1657_s5 + $0x94] sm:$0xf0]  ;;  %v953_v37 = vld [vmem:[%s1657_s5 + $0x98] sm:$0xf0]  ;;  %v895_v39 = vld [vmem:[%s1657_s5 + $0x20] sm:$0xf] }
  0x3a   :  { %615 = vmatpush.bf16.msrb.mxu2 %v920_v56  ;;  %v1058_v40 = vld [vmem:[%s1657_s5 + $0x24] sm:$0xf0]  ;;  %v1057_v41 = vld [vmem:[%s1657_s5 + $0x24] sm:$0xf]  ;;  %v897_v43 = vld [vmem:[%s1657_s5 + $0x28] sm:$0xf0] }
  0x3b   :  { %v896_v42 = vor.u32 %v1058_v40, %v895_v39  ;;  %v900_v44 = vor.u32 %v1057_v41, %v897_v43  ;;  %v943_v45 = vld [vmem:[%s1657_s5 + $0x80] sm:$0xf]  ;;  %v1069_v47 = vld [vmem:[%s1657_s5 + $0x84] sm:$0xf]  ;;  %v887_v51 = vld [vmem:[%s1657_s5 + $0x10] sm:$0xf] }
  0x3c   :  { %391 = vmatpush.bf16.msrb.mxu0 %v764_v2  ;;  %v1075_v2 = vld [vmem:[%s1657_s5 + $0xb4] sm:$0xf]  ;;  %v1056_v52 = vld [vmem:[%s1657_s5 + $0x14] sm:$0xf0]  ;;  %v889_v55 = vld [vmem:[%s1657_s5 + $0x18] sm:$0xf0] }
  0x3d   :  { %404 = vmatpush.bf16.msrb.mxu1 %v828_v5  ;;  %v916_v5 = vor.u32 %v1061_v61, %v913_v62  ;;  %629 = vmatpush.bf16.msrb.mxu3 %v976_v59  ;;  %v972_v7 = vor.u32 %v1075_v2, %v969_v3  ;;  %v888_v53 = vor.u32 %v1056_v52, %v887_v51  ;;  %v1055_v54 = vld [vmem:[%s1657_s5 + $0x14] sm:$0xf]  ;;  %v1054_v58 = vld [vmem:[%s1657_s5 + $0x4] sm:$0xf0]  ;;  %v1053_v59 = vld [vmem:[%s1657_s5 + $0x4] sm:$0xf] }
  0x3e   :  { %616 = vmatpush.bf16.msrb.mxu2 %v912_v4  ;;  %v892_v56 = vor.u32 %v1055_v54, %v889_v55  ;;  %v881_v61 = vld [vmem:[%s1657_s5 + $0x8] sm:$0xf0]  ;;  %s674_s27 = sshll.u32 %s1116_s26, 4  ;;  %s675_s27 = int_to_ptr.vmem [resolvable:$true] %s674_s27 }
  0x3f   :  { %v884_v62 = vor.u32 %v1053_v59, %v881_v61 }
  0x40   :  { %392 = vmatpush.bf16.msrb.mxu0 %v756_v14  ;;  %v47_v14 = vperm.slane %v45_v10, 0 }
  0x41   :  { %405 = vmatpush.bf16.msrb.mxu1 %v820_v17  ;;  %630 = vmatpush.bf16.msrb.mxu3 %v968_v6 }
  0x42   :  { %617 = vmatpush.bf16.msrb.mxu2 %v904_v30 }
  0x44   :  { %639 = vmatpush.bf16.msra.mxu0 %v940_v35  ;;  %v1071_v35 = vld [vmem:[%s1657_s5 + $0x94] sm:$0xf] }
  0x45   :  { %652 = vmatpush.bf16.msra.mxu1 %v1004_v25  ;;  %631 = vmatpush.bf16.msrb.mxu3 %v960_v13  ;;  %v956_v38 = vor.u32 %v1071_v35, %v953_v37 }
  0x46   :  { %618 = vmatpush.bf16.msrb.mxu2 %v896_v42 }
  0x48   :  { %640 = vmatpush.bf16.msra.mxu0 %v932_v46  ;;  %v1070_v46 = vld [vmem:[%s1657_s5 + $0x84] sm:$0xf0] }
  0x49   :  { %653 = vmatpush.bf16.msra.mxu1 %v996_v33  ;;  %v951_v33 = vld [vmem:[%s1657_s5 + $0x90] sm:$0xf]  ;;  %v944_v48 = vor.u32 %v1070_v46, %v943_v45 }
  0x4a   :  { %v952_v36 = vor.u32 %v1072_v34, %v951_v33  ;;  %619 = vmatpush.bf16.msrb.mxu2 %v888_v53 }
  0x4c   :  { %641 = vmatpush.bf16.msra.mxu0 %v924_v57  ;;  %632 = vmatpush.bf16.msrb.mxu3 %v952_v36  ;;  %v879_v57 = vld [vmem:[%s1657_s5] sm:$0xf] }
  0x4d   :  { %654 = vmatpush.bf16.msra.mxu1 %v988_v49  ;;  %v945_v49 = vld [vmem:[%s1657_s5 + $0x88] sm:$0xf0]  ;;  %v880_v60 = vor.u32 %v1054_v58, %v879_v57 }
  0x4e   :  { %v948_v50 = vor.u32 %v1069_v47, %v945_v49 }
  0x4f   :  { %620 = vmatpush.bf16.msrb.mxu2 %v880_v60 }
  0x50   :  { %642 = vmatpush.bf16.msra.mxu0 %v916_v5  ;;  %633 = vmatpush.bf16.msrb.mxu3 %v944_v48 }
  0x51   :  { %655 = vmatpush.bf16.msra.mxu1 %v980_v63  ;;  %v193_v63 = vld [vmem:[%s1656_s4] sm:$0x3] }
  0x52   :  { %v196_v0 = vperm.slane %v193_v63, 1  ;;  %v195_v5 = vperm.slane %v193_v63, 0 }
  0x54   :  { %643 = vmatpush.bf16.msra.mxu0 %v908_v32 }
  0x55   :  { %656 = vmatpush.bf16.msra.mxu1 %v972_v7 }
  0x58   :  { %644 = vmatpush.bf16.msra.mxu0 %v900_v44 }
  0x59   :  { %657 = vmatpush.bf16.msra.mxu1 %v964_v15 }
  0x5c   :  { %645 = vmatpush.bf16.msra.mxu0 %v892_v56 }
  0x5d   :  { %658 = vmatpush.bf16.msra.mxu1 %v956_v38 }
  0x60   :  { %646 = vmatpush.bf16.msra.mxu0 %v884_v62 }
  0x61   :  { %659 = vmatpush.bf16.msra.mxu1 %v948_v50 }
  0xa0   :  { %v140_v17 = vpop.f32.mrf.mxu0 }
  0xa1   :  { %v141_v18 = vadd.f32 %v140_v17, %v47_v14  ;;  %v153_v19 = vpop.f32.mrf.mxu1 }
  0xa2   :  { %v154_v20 = vadd.f32 %v153_v19, %v48_v16  ;;  %v447_v19 = vld [vmem:[%s1658_s6] sm:$0x3]  ;;  %s676_s6 = sshll.u32 %s1659_s7, 4  ;;  %s677_s6 = int_to_ptr.hbm [resolvable:$true] %s676_s6 }
  0xa3   :  { %v157_v21 = vmax.f32 %v141_v18, 0.0 }
  0xa4   :  { %v158_v22 = vmax.f32 %v154_v20, 0.0  ;;  %v450_v20 = vperm.slane %v447_v19, 1 }
  0xa5   :  { %v159_v23 = vpack.c.bf16 %v157_v21, %v157_v21 }
  0xa6   :  { %v160_v24 = vpack.c.bf16 %v158_v22, %v158_v22 }
  0xa7   :  { %367 = vmatmul.bf16.vlgmr.msra.gmra.mxu2 %v159_v23  ;;  %393 = vmatmul.bf16.vlgmr.msrb.gmra.mxu0 %v159_v23 }
  0xa8   :  { %380 = vmatmul.bf16.vlgmr.msra.gmra.mxu3 %v160_v24  ;;  %406 = vmatmul.bf16.vlgmr.msrb.gmra.mxu1 %v160_v24  ;;  %v142_v25 = vpop.f32.mrf.mxu0 }
  0xa9   :  { %v155_v26 = vpop.f32.mrf.mxu1  ;;  %v449_v25 = vperm.slane %v447_v19, 0 }
 0x124   :  { %v394_v1 = vpop.f32.mrf.mxu0 }
 0x125   :  { %v395_v2 = vadd.f32 %v394_v1, %v196_v0  ;;  %v407_v3 = vpop.f32.mrf.mxu1 }
 0x127   :  { %v408_v4 = vadd.f32 %v407_v3, %v395_v2 }
 0x129   :  { %v412_v6 = vmax.f32 %v408_v4, 0.0 }
 0x12a   :  { %v368_v7 = vpop.f32.mrf.mxu2 }
 0x12b   :  { %v414_v8 = vpack.c.bf16 %v412_v6, %v412_v6  ;;  %v369_v9 = vadd.f32 %v368_v7, %v195_v5  ;;  %v381_v10 = vpop.f32.mrf.mxu3 }
 0x12c   :  { %v396_v11 = vpop.f32.mrf.mxu0 }
 0x12d   :  { %v382_v12 = vadd.f32 %v381_v10, %v369_v9  ;;  %v409_v13 = vpop.f32.mrf.mxu1  ;;  %634 = vmatmul.bf16.vlgmr.msrb.gmra.mxu3 %v414_v8  ;;  %660 = vmatmul.bf16.vlgmr.msra.gmra.mxu1 %v414_v8 }
 0x12f   :  { %v411_v14 = vmax.f32 %v382_v12, 0.0 }
 0x131   :  { %v413_v15 = vpack.c.bf16 %v411_v14, %v411_v14 }
 0x132   :  { %v370_v16 = vpop.f32.mrf.mxu2 }
 0x133   :  { %v383_v17 = vpop.f32.mrf.mxu3  ;;  %621 = vmatmul.bf16.vlgmr.msrb.gmra.mxu2 %v413_v15  ;;  %647 = vmatmul.bf16.vlgmr.msra.gmra.mxu0 %v413_v15 }
 0x1aa   :  { %v661_v18 = vpop.f32.mrf.mxu1 }
 0x1b0   :  { %v635_v21 = vpop.f32.mrf.mxu3  ;;  %v648_v22 = vpop.f32.mrf.mxu0 }
 0x1b1   :  { %v649_v23 = vadd.f32 %v648_v22, %v450_v20 }
 0x1b2   :  { %v663_v24 = vpop.f32.mrf.mxu1 }
 0x1b3   :  { %v662_v26 = vadd.f32 %v661_v18, %v649_v23 }
 0x1b5   :  { %1086 = vtanh.f32 %v662_v26 }
 0x1b6   :  { %v622_v27 = vpop.f32.mrf.mxu2 }
 0x1b7   :  { %v623_v28 = vadd.f32 %v622_v27, %v449_v25 }
 0x1b8   :  { %v637_v29 = vpop.f32.mrf.mxu3  ;;  %v650_v30 = vpop.f32.mrf.mxu0 }
 0x1b9   :  { %v636_v31 = vadd.f32 %v635_v21, %v623_v28 }
 0x1bb   :  { %1088 = vtanh.f32 %v636_v31  ;;  %v1087_v33 = vpop.eup %1086 }
 0x1be   :  { %v624_v32 = vpop.f32.mrf.mxu2 }
 0x1c1   :  { %v1089_v34 = vpop.eup %1088 }
 0x1c2   :  { %v667_v35 = vpack.c.bf16 %v1087_v33, %v1089_v34 }
 0x1c4   :  { %668 = vst [vmem:[#allocation2] sm:$0xff] %v667_v35 }
 0x1c5   :  { %679 = dma.vmem_to_hbm [thread:$0]  %s675_s27, 128, %s677_s6, [#allocation3]  }
 0x1c6   :  { %1114 = dma.done.wait [#allocation3], 128  }
 0x1c7   :  { %1115 = vsyncadd [#allocation3], 4294967168 }
 0x1c8   :  { %684 = vsyncpa [#allocation3], 1 }

</bundles_post_ra>
